<compile_context>
chip_gen: v7x
topology: tpu7x:2x2x1
jax: 0.10.0
libtpu: 0.0.40
codegen_flags: <defaults>
</compile_context>

<pallas_src>
import jax
import jax.numpy as jnp
import numpy as np
from jax.experimental import pallas as pl
from jax.experimental.pallas import tpu as pltpu

KERNEL_SIZE = 5
BN_EPS = 1e-5


def _conv_stats_kernel(w_ref, x_ref, conv_ref, sum_ref, sq_ref):
    # w_ref:    (c_tile, C_in*K)      reshaped conv weight (bias dropped: cancels under train-mode BN)
    # x_ref:    (C_in*K, n_tile)      im2col activation tile (K taps + batch folded in)
    # conv_ref: (c_tile, n_tile) f32  conv output tile (written directly, no extra scratch)
    # sum_ref:  (c_tile, 1) f32       per-channel sum, resident across the N axis
    # sq_ref:   (c_tile, 1) f32       per-channel sum of squares, resident across the N axis
    j = pl.program_id(1)

    @pl.when(j == 0)
    def _():
        sum_ref[...] = jnp.zeros_like(sum_ref)
        sq_ref[...] = jnp.zeros_like(sq_ref)

    conv = jnp.dot(w_ref[...], x_ref[...], preferred_element_type=jnp.float32)
    conv_ref[...] = conv
    sum_ref[...] += jnp.sum(conv, axis=1, keepdims=True)
    sq_ref[...] += jnp.sum(conv * conv, axis=1, keepdims=True)


def _bn_swish_kernel(conv_ref, scale_ref, shift_ref, out_ref):
    # conv_ref:  (c_tile, n_tile) f32
    # scale_ref: (c_tile, 1) f32   gamma / sqrt(var + eps)
    # shift_ref: (c_tile, 1) f32   beta  - mean * scale
    y = conv_ref[...] * scale_ref[...] + shift_ref[...]
    out_ref[...] = (y * jax.nn.sigmoid(y)).astype(out_ref.dtype)


def _pick_tile(total, candidates=(512, 256, 128)):
    for c in candidates:
        if total % c == 0:
            return c
    return total


def contextnet_conv_module(inputs, input_lengths, weight, bias, gamma, beta, stride=1):
    """inputs: (B, C_in, L); input_lengths: (B,) int32.  Returns (out, out_lengths)."""
    del bias  # Conv bias cancels exactly under train-mode BatchNorm (x - mean removes it).
    B, C_in, L = inputs.shape
    C_out, _, K = weight.shape
    assert K == KERNEL_SIZE, "The convolution layer in the ContextNet model has 5 kernels."
    if stride != 1:
        # TODO(synk): stride=2 (non-padded, strided) conv path not implemented in this kernel.
        raise NotImplementedError("only stride=1 path implemented")

    pad = (K - 1) // 2
    L_out = (L + 2 * pad - (K - 1) - 1) // stride + 1

    # ---- host-side im2col: fold the K taps into the contraction and batch into lanes ----
    x_pad = jnp.pad(inputs, ((0, 0), (0, 0), (pad, pad)))
    cols = [x_pad[:, :, k:k + L_out] for k in range(K)]            # K x (B, C_in, L_out)
    xcol = jnp.stack(cols, axis=2).reshape(B, C_in * K, L_out)     # (B, C_in*K, L_out)
    xcol = jnp.transpose(xcol, (1, 0, 2)).reshape(C_in * K, B * L_out)

    n_real = B * L_out
    n_pad = ((n_real + 127) // 128) * 128
    xcol = jnp.pad(xcol, ((0, 0), (0, n_pad - n_real)))            # zero cols add 0 to stats

    w2 = weight.reshape(C_out, C_in * K)                           # lane-contiguous weight

    c_tile = 128 if (C_out % 128 == 0) else C_out
    n_tile = _pick_tile(n_pad)
    grid = (C_out // c_tile, n_pad // n_tile)

    conv_cost = pl.CostEstimate(
        flops=2 * C_out * C_in * K * n_pad + 3 * C_out * n_pad,
        transcendentals=0,
        bytes_accessed=4 * (w2.size + xcol.size + C_out * n_pad + 2 * C_out),
    )
    conv_out, ssum, ssq = pl.pallas_call(
        _conv_stats_kernel,
        grid=grid,
        in_specs=[
            pl.BlockSpec((c_tile, C_in * K), lambda i, j: (i, 0)),
            pl.BlockSpec((C_in * K, n_tile), lambda i, j: (0, j)),
        ],
        out_specs=(
            pl.BlockSpec((c_tile, n_tile), lambda i, j: (i, j)),
            pl.BlockSpec((c_tile, 1), lambda i, j: (i, 0)),
            pl.BlockSpec((c_tile, 1), lambda i, j: (i, 0)),
        ),
        out_shape=(
            jax.ShapeDtypeStruct((C_out, n_pad), jnp.float32),
            jax.ShapeDtypeStruct((C_out, 1), jnp.float32),
            jax.ShapeDtypeStruct((C_out, 1), jnp.float32),
        ),
        compiler_params=pltpu.CompilerParams(
            dimension_semantics=("parallel", "arbitrary")),
        cost_estimate=conv_cost,
    )(w2, xcol)

    # ---- tiny per-channel BN scale/shift from the fused stats (train-mode, biased var) ----
    count = jnp.float32(n_real)
    mean = ssum[:, 0] / count
    var = jnp.maximum(ssq[:, 0] / count - mean * mean, 0.0)
    scale = gamma * jax.lax.rsqrt(var + BN_EPS)
    shift = beta - mean * scale

    bn_cost = pl.CostEstimate(
        flops=4 * C_out * n_pad,
        transcendentals=C_out * n_pad,
        bytes_accessed=4 * (2 * C_out * n_pad + 2 * C_out),
    )
    out_flat = pl.pallas_call(
        _bn_swish_kernel,
        grid=grid,
        in_specs=[
            pl.BlockSpec((c_tile, n_tile), lambda i, j: (i, j)),
            pl.BlockSpec((c_tile, 1), lambda i, j: (i, 0)),
            pl.BlockSpec((c_tile, 1), lambda i, j: (i, 0)),
        ],
        out_specs=pl.BlockSpec((c_tile, n_tile), lambda i, j: (i, j)),
        out_shape=jax.ShapeDtypeStruct((C_out, n_pad), inputs.dtype),
        compiler_params=pltpu.CompilerParams(
            dimension_semantics=("parallel", "parallel")),
        cost_estimate=bn_cost,
    )(conv_out, scale.reshape(C_out, 1), shift.reshape(C_out, 1))

    out = out_flat[:, :n_real].reshape(C_out, B, L_out).transpose(1, 0, 2)
    out_lengths = (input_lengths + 2 * pad - (K - 1) - 1) // stride + 1
    return out, out_lengths


def _reference(inputs, input_lengths, weight, bias, gamma, beta, stride=1):
    pad = (KERNEL_SIZE - 1) // 2
    out = jax.lax.conv_general_dilated(
        inputs, weight, window_strides=(stride,), padding=[(pad, pad)],
        dimension_numbers=("NCH", "OIH", "NCH"),
        precision=jax.lax.Precision.HIGHEST)
    out = out + bias[None, :, None]
    mean = jnp.mean(out, axis=(0, 2), keepdims=True)
    var = jnp.mean((out - mean) ** 2, axis=(0, 2), keepdims=True)
    y = (out - mean) / jnp.sqrt(var + BN_EPS)
    y = y * gamma[None, :, None] + beta[None, :, None]
    y = y * jax.nn.sigmoid(y)
    lengths = (input_lengths + 2 * pad - (KERNEL_SIZE - 1) - 1) // stride + 1
    return y, lengths


if __name__ == "__main__":
    B, C_IN, C_OUT, L = 2, 4, 8, 16

    key = jax.random.PRNGKey(0)
    k_x, k_w, k_b, k_g, k_be = jax.random.split(key, 5)

    inputs = jax.random.normal(k_x, (B, C_IN, L), dtype=jnp.float32)
    input_lengths = jnp.array([16, 12], dtype=jnp.int32)

    # Deterministic synthetic parameters (Conv1d weight/bias + BN affine params).
    weight = jax.random.normal(k_w, (C_OUT, C_IN, KERNEL_SIZE), dtype=jnp.float32) * 0.2
    bias = jax.random.normal(k_b, (C_OUT,), dtype=jnp.float32) * 0.1
    gamma = 1.0 + 0.1 * jax.random.normal(k_g, (C_OUT,), dtype=jnp.float32)
    beta = 0.1 * jax.random.normal(k_be, (C_OUT,), dtype=jnp.float32)

    out, out_lengths = contextnet_conv_module(inputs, input_lengths, weight, bias, gamma, beta)
    out = jax.block_until_ready(out)
    out_lengths = jax.block_until_ready(out_lengths)

    ref_out, ref_lengths = _reference(inputs, input_lengths, weight, bias, gamma, beta)
    np.testing.assert_allclose(np.asarray(out), np.asarray(ref_out), rtol=1e-2, atol=1e-2)
    np.testing.assert_array_equal(np.asarray(out_lengths), np.asarray(ref_lengths))

    print("KERNEL_OK")
</pallas_src>

<mosaic_0001>
module attributes {stable_mosaic.version = 11 : i64} {
  func.func @_conv_stats_kernel(%arg0: i32, %arg1: i32, %arg2: memref<8x20xf32, #tpu.memory_space<vmem>>, %arg3: memref<20x128xf32, #tpu.memory_space<vmem>>, %arg4: memref<8x128xf32, #tpu.memory_space<vmem>>, %arg5: memref<8x1xf32, #tpu.memory_space<vmem>>, %arg6: memref<8x1xf32, #tpu.memory_space<vmem>>) attributes {dimension_semantics = [#tpu.dimension_semantics<parallel>, #tpu.dimension_semantics<arbitrary>], iteration_bounds = array<i64: 1, 1>, scalar_prefetch = 0 : i64, scratch_operands = 0 : i64, tpu.core_type = #tpu.core_type<tc>, window_params = [{transform_indices = @transform_0, window_bounds = array<i64: 8, 20>}, {transform_indices = @transform_1, window_bounds = array<i64: 20, 128>}, {transform_indices = @transform_2, window_bounds = array<i64: 8, 128>}, {transform_indices = @transform_3, window_bounds = array<i64: 8, 1>}, {transform_indices = @transform_4, window_bounds = array<i64: 8, 1>}]} {
    %c0_i32 = arith.constant 0 : i32
    %0 = arith.cmpi eq, %arg1, %c0_i32 : i32
    %1 = arith.extui %0 : i1 to i32
    %c0_i32_0 = arith.constant 0 : i32
    %2 = arith.cmpi ne, %1, %c0_i32_0 : i32
    scf.if %2 {
      %cst_16 = arith.constant 0.000000e+00 : f32
      %18 = vector.broadcast %cst_16 : f32 to vector<8x1xf32>
      %c0_17 = arith.constant 0 : index
      %c0_18 = arith.constant 0 : index
      %19 = vector.load %arg5[%c0_17, %c0_18] : memref<8x1xf32, #tpu.memory_space<vmem>>, vector<8x1xf32>
      tpu.vector_store %arg5[%c0_17, %c0_18], %18 {strides = array<i32>} : memref<8x1xf32, #tpu.memory_space<vmem>>, vector<8x1xf32>,
      %cst_19 = arith.constant 0.000000e+00 : f32
      %20 = vector.broadcast %cst_19 : f32 to vector<8x1xf32>
      %c0_20 = arith.constant 0 : index
      %c0_21 = arith.constant 0 : index
      %21 = vector.load %arg6[%c0_20, %c0_21] : memref<8x1xf32, #tpu.memory_space<vmem>>, vector<8x1xf32>
      tpu.vector_store %arg6[%c0_20, %c0_21], %20 {strides = array<i32>} : memref<8x1xf32, #tpu.memory_space<vmem>>, vector<8x1xf32>,
    } else {
    }
    %c0 = arith.constant 0 : index
    %c0_1 = arith.constant 0 : index
    %3 = vector.load %arg2[%c0, %c0_1] : memref<8x20xf32, #tpu.memory_space<vmem>>, vector<8x20xf32>
    %c0_2 = arith.constant 0 : index
    %c0_3 = arith.constant 0 : index
    %4 = vector.load %arg3[%c0_2, %c0_3] : memref<20x128xf32, #tpu.memory_space<vmem>>, vector<20x128xf32>
    %cst = arith.constant dense<0.000000e+00> : vector<8x128xf32>
    %5 = tpu.matmul %3, %4, %cst {dimension_numbers = #tpu.dot_dimension_numbers<[1], [0], [0], [1], [0, 0, 1, 1], [], []>} : vector<8x20xf32>, vector<20x128xf32>, vector<8x128xf32> -> vector<8x128xf32>
    %c0_4 = arith.constant 0 : index
    %c0_5 = arith.constant 0 : index
    %6 = vector.load %arg4[%c0_4, %c0_5] : memref<8x128xf32, #tpu.memory_space<vmem>>, vector<8x128xf32>
    tpu.vector_store %arg4[%c0_4, %c0_5], %5 {strides = array<i32>} : memref<8x128xf32, #tpu.memory_space<vmem>>, vector<8x128xf32>,
    %c0_6 = arith.constant 0 : index
    %c0_7 = arith.constant 0 : index
    %7 = vector.load %arg5[%c0_6, %c0_7] : memref<8x1xf32, #tpu.memory_space<vmem>>, vector<8x1xf32>
    %cst_8 = arith.constant dense<0.000000e+00> : vector<8xf32>
    %8 = vector.multi_reduction <add>, %5, %cst_8 [1] : vector<8x128xf32> to vector<8xf32>
    %9 = vector.shape_cast %8 : vector<8xf32> to vector<8x1xf32>
    %10 = arith.addf %7, %9 : vector<8x1xf32>
    %c0_9 = arith.constant 0 : index
    %c0_10 = arith.constant 0 : index
    %11 = vector.load %arg5[%c0_9, %c0_10] : memref<8x1xf32, #tpu.memory_space<vmem>>, vector<8x1xf32>
    tpu.vector_store %arg5[%c0_9, %c0_10], %10 {strides = array<i32>} : memref<8x1xf32, #tpu.memory_space<vmem>>, vector<8x1xf32>,
    %c0_11 = arith.constant 0 : index
    %c0_12 = arith.constant 0 : index
    %12 = vector.load %arg6[%c0_11, %c0_12] : memref<8x1xf32, #tpu.memory_space<vmem>>, vector<8x1xf32>
    %13 = arith.mulf %5, %5 : vector<8x128xf32>
    %cst_13 = arith.constant dense<0.000000e+00> : vector<8xf32>
    %14 = vector.multi_reduction <add>, %13, %cst_13 [1] : vector<8x128xf32> to vector<8xf32>
    %15 = vector.shape_cast %14 : vector<8xf32> to vector<8x1xf32>
    %16 = arith.addf %12, %15 : vector<8x1xf32>
    %c0_14 = arith.constant 0 : index
    %c0_15 = arith.constant 0 : index
    %17 = vector.load %arg6[%c0_14, %c0_15] : memref<8x1xf32, #tpu.memory_space<vmem>>, vector<8x1xf32>
    tpu.vector_store %arg6[%c0_14, %c0_15], %16 {strides = array<i32>} : memref<8x1xf32, #tpu.memory_space<vmem>>, vector<8x1xf32>,
    return
  }
  func.func @transform_0(%arg0: i32, %arg1: i32) -> (i32, i32) {
    %c0_i32 = arith.constant 0 : i32
    %c0_i32_0 = arith.constant 0 : i32
    return %arg0, %c0_i32 : i32, i32
  }
  func.func @transform_1(%arg0: i32, %arg1: i32) -> (i32, i32) {
    %c0_i32 = arith.constant 0 : i32
    %c0_i32_0 = arith.constant 0 : i32
    return %c0_i32, %arg1 : i32, i32
  }
  func.func @transform_2(%arg0: i32, %arg1: i32) -> (i32, i32) {
    %c0_i32 = arith.constant 0 : i32
    return %arg0, %arg1 : i32, i32
  }
  func.func @transform_3(%arg0: i32, %arg1: i32) -> (i32, i32) {
    %c0_i32 = arith.constant 0 : i32
    %c0_i32_0 = arith.constant 0 : i32
    return %arg0, %c0_i32 : i32, i32
  }
  func.func @transform_4(%arg0: i32, %arg1: i32) -> (i32, i32) {
    %c0_i32 = arith.constant 0 : i32
    %c0_i32_0 = arith.constant 0 : i32
    return %arg0, %c0_i32 : i32, i32
  }
}

</mosaic_0001>

<bundles_post_ra>
// kernel: tpu_custom_call.1
= control target key start
LH: loop header
LB: loop body
LE: loop exit
PB: predicated region body
PF: predicated region fallthrough
CT: control target
= control target key end

     0   :  { %10 = vsyncpa [#allocation3], 0  ;;  %s363_s0 = inlined_call_operand.hbm [shape: f32[8,20], index: 0, kind: input, shape index: {}]   ;;  %s364_s1 = inlined_call_operand.hbm [shape: f32[20,128], index: 1, kind: input, shape index: {}]   ;;  %s365_s2 = inlined_call_operand.hbm [shape: f32[8,128], index: 2, kind: output, shape index: {0}]   ;;  %s366_s3 = inlined_call_operand.vmem [shape: f32[8,1], index: 3, kind: output, shape index: {1}]   ;;  %s367_s4 = inlined_call_operand.vmem [shape: f32[8,1], index: 4, kind: output, shape index: {2}]  }
   0x1   :  { %11 = vsyncpa [#allocation6], 0 }
   0x2   :  { %12 = vsyncpa [#allocation4], 0  ;;  %s265_s15 = smov [#allocation2]   ;;  %s266_s17 = smov [#allocation5]  }
   0x3   :  { %s19_s16 = sshll.u32 %s265_s15, 4  ;;  %s28_s18 = sshll.u32 %s266_s17, 4  ;;  %s20_s16 = int_to_ptr.vmem [resolvable:$true] %s19_s16  ;;  %s298_s18 = int_to_ptr.vmem [resolvable:$true] %s28_s18 }
   0x4   :  { %s193_s21 = scalar_lea.hbm %s363_s0, 128 }
   0x5   :  { %p194_p0 = scmp.ne.s32.totalorder %s363_s0, %s193_s21  ;;  %p197_p1 = scmp.lt.u32.totalorder %s193_s21, %s363_s0 }
   0x7   :  { %p199_p2 = pnand %p197_p1, %p194_p0 }
   0x9   :  { %202 = shalt.err (!%p199_p2)
}
   0xa   :  { %s203_s26 = scalar_lea.vmem %s20_s16, 128  ;;  %p208_p4 = scmp.lt.s32.totalorder %s20_s16, %s20_s16 }
   0xb   :  { %p204_p3 = scmp.ne.s32.totalorder %s20_s16, %s203_s26  ;;  %p209_p5 = scmp.lt.s32.totalorder %s203_s26, %s203_s26 }
   0xd   :  { %p210_p6 = por %p209_p5, %p208_p4 }
   0xf   :  { %p211_p7 = pnand %p210_p6, %p204_p3 }
  0x11   :  { %214 = shalt.err (!%p211_p7)
}
  0x12   :  { %22 = dma.hbm_to_vmem [thread:$0]  %s363_s0, 128, %s20_s16, [#allocation3]  }
  0x13   :  { %s215_s5 = scalar_lea.hbm %s364_s1, 384 }
  0x14   :  { %p216_p8 = scmp.ne.s32.totalorder %s364_s1, %s215_s5  ;;  %p219_p9 = scmp.lt.u32.totalorder %s215_s5, %s364_s1 }
  0x16   :  { %p221_p10 = pnand %p219_p9, %p216_p8 }
  0x18   :  { %224 = shalt.err (!%p221_p10)
}
  0x19   :  { %s225_s10 = scalar_lea.vmem %s298_s18, 384  ;;  %p230_p12 = scmp.lt.s32.totalorder %s298_s18, %s298_s18 }
  0x1a   :  { %p226_p11 = scmp.ne.s32.totalorder %s298_s18, %s225_s10  ;;  %p231_p13 = scmp.lt.s32.totalorder %s225_s10, %s225_s10 }
  0x1c   :  { %p232_p0 = por %p231_p13, %p230_p12 }
  0x1e   :  { %p233_p1 = pnand %p232_p0, %p226_p11 }
  0x20   :  { %236 = shalt.err (!%p233_p1)
}
  0x21   :  { %s267_s0 = smov 128   ;;  %s268_s11 = smov 8  }
  0x22   :  { %34 = dma.hbm_to_vmem [thread:$0]  %s364_s1, 384, %s298_s18, [#allocation6], %s267_s0, %s267_s0, %s268_s11  }
  0x23   :  { %259 = dma.done.wait [#allocation3], 128  }
  0x24   :  { %260 = vsyncadd [#allocation3], 4294967168 }
  0x25   :  { %261 = dma.done.wait [#allocation6], 384  }
  0x26   :  { %262 = vsyncadd [#allocation6], 4294966912  ;;  %vm45_vm0 = vcmask 7168   ;;  %v269_v0 = vmov 0.0|0.0   ;;  %v270_v1 = vmov 0.0   ;;  %vm271_vm1 = vmmov 0  }
  0x27   :  { %182 = vmatprep.subr.bf16.mxu0 %v269_v0  ;;  %46 = vst.msk [vmem:[%s366_s3] sm:$0xff] %vm45_vm0, %v270_v1  ;;  %47 = vst.msk [vmem:[%s367_s4] sm:$0xff] %vm45_vm0, %v270_v1  ;;  %179 = vmatprep.mubr.msk.f32.mxu0 %vm271_vm1, %v270_v1  ;;  %v49_v2 = vld [vmem:[#allocation5] sm:$0xff]  ;;  %v50_v3 = vld [vmem:[#allocation5 + $0x8] sm:$0xff]  ;;  %vm56_vm2 = vcmask 1043456   ;;  %vm52_vm3 = vcmask 162816  }
  0x28   :  { %v183_v4 = vpack.c.bf16 %v50_v3, %v49_v2  ;;  %v51_v5 = vld [vmem:[#allocation5 + $0x10] sm:$0xf]  ;;  %v48_v6 = vld [vmem:[#allocation2] sm:$0xff]  ;;  %s272_s1 = smov [#allocation7]  }
  0x29   :  { %s149_s18 = sshll.u32 %s272_s1, 4  ;;  %s150_s18 = int_to_ptr.vmem [resolvable:$true] %s149_s18 }
  0x2a   :  { %184 = vmatpush3.bf16.msra.mxu0 %v183_v4  ;;  %s237_s19 = scalar_lea.vmem %s150_s18, 128  ;;  %p242_p3 = scmp.lt.s32.totalorder %s150_s18, %s150_s18 }
  0x2b   :  { %177 = vmatprep.subr.mxu0 %v270_v1  ;;  %p238_p2 = scmp.ne.s32.totalorder %s150_s18, %s237_s19  ;;  %p243_p4 = scmp.lt.s32.totalorder %s237_s19, %s237_s19 }
  0x2d   :  { %p244_p5 = por %p243_p4, %p242_p3 }
  0x2e   :  { %178 = vmatpush3.msk.msra.mxu0 %vm56_vm2, %v51_v5 }
  0x2f   :  { %180 = vmatmul.mubr.msk.f32.vlgmr.msra.gmra.mrb[0].mxu0 %vm52_vm3, %v48_v6  ;;  %p245_p6 = pnand %p244_p5, %p238_p2 }
 0x102   :  { %v126_v7 = vpop.f32.mrb[0].mxu0 }
 0x103   :  { %130 = vst [vmem:[#allocation7] sm:$0xff] %v126_v7  ;;  %132 = vadd.xlane.f32.xlu0 %v126_v7  ;;  %v181_v8 = vpop.f32.mrb[1].mxu0  ;;  %v138_v9 = vmul.f32 %v126_v7, %v126_v7 }
 0x107   :  { %139 = vadd.xlane.f32.xlu0 %v138_v9 }
 0x108   :  { %248 = shalt.err (!%p245_p6)
}
 0x109   :  { %s249_s22 = scalar_lea.hbm %s365_s2, 128 }
 0x10a   :  { %p250_p7 = scmp.ne.s32.totalorder %s365_s2, %s249_s22  ;;  %p253_p8 = scmp.lt.u32.totalorder %s249_s22, %s365_s2 }
 0x10c   :  { %p255_p9 = pnand %p253_p8, %p250_p7 }
 0x10e   :  { %258 = shalt.err (!%p255_p9)
}
 0x10f   :  { %152 = dma.vmem_to_hbm [thread:$0]  %s150_s18, 128, %s365_s2, [#allocation4]   ;;  %v131_v10 = vld [vmem:[%s366_s3] sm:$0xff] }
 0x110   :  { %v137_v13 = vld [vmem:[%s367_s4] sm:$0xff] }
 0x190   :  { %v133_v11 = vpop.xlane.xlu0 %132 }
 0x191   :  { %v134_v12 = vadd.f32 %v133_v11, %v131_v10 }
 0x193   :  { %136 = vst.msk [vmem:[%s366_s3] sm:$0xff] %vm45_vm0, %v134_v12 }
 0x194   :  { %v140_v14 = vpop.xlane.xlu0 %139 }
 0x195   :  { %v141_v15 = vadd.f32 %v140_v14, %v137_v13 }
 0x197   :  { %142 = vst.msk [vmem:[%s367_s4] sm:$0xff] %vm45_vm0, %v141_v15 }
 0x198   :  { %263 = dma.done.wait [#allocation4], 128  }
 0x199   :  { %264 = vsyncadd [#allocation4], 4294967168 }
 0x19a   :  { %164 = vsyncpa [#allocation3], 1 }
 0x19b   :  { %165 = vsyncpa [#allocation6], 1 }
 0x19c   :  { %166 = vsyncpa [#allocation4], 1 }

</bundles_post_ra>
